<compile_context>
chip_gen: v7x
topology: tpu7x:2x2x1
jax: 0.10.0
libtpu: 0.0.40
codegen_flags: <defaults>
</compile_context>

<pallas_src>
import functools
import math

import jax
import jax.numpy as jnp
from jax import lax
from jax.experimental import pallas as pl
from jax.experimental.pallas import tpu as pltpu


def _embed_kernel(ids_ref, table_ref, o_ref, *, scale):
    # ids_ref  : (tm, 1) int32     token ids for this row tile
    # table_ref: (n_token, D) f32  full embedding table (resident in VMEM)
    # o_ref    : (tm, D)           scaled embeddings for this row tile
    tm = ids_ref.shape[0]
    n_token = table_ref.shape[0]

    ids = ids_ref[...]                                          # (tm, 1)
    iota = lax.broadcasted_iota(jnp.int32, (tm, n_token), 1)    # lane iota
    onehot = (iota == ids).astype(table_ref.dtype)              # (tm, n_token)
    # Exact gather: each output row has exactly one 1.0 in the one-hot row.
    emb = jnp.dot(onehot, table_ref[...], preferred_element_type=jnp.float32)
    o_ref[...] = (emb * scale).astype(o_ref.dtype)


@functools.partial(jax.jit, static_argnames=("tm",))
def token_embedding_layer(ids, table, *, tm=256):
    """ids: (B, S) int32 token ids; table: (n_token, D) float32 -> (B, S, D)."""
    B, S = ids.shape
    n_token, D = table.shape
    M = B * S

    # Large row tile (up to 256) to fill the MXU rows and amortize the ~0.35 us
    # per-grid-step overhead; keep it a multiple of 8 (sublane) and <= M.
    tm_eff = min(tm, M)
    tm_eff = max(8, (tm_eff // 8) * 8)
    Mp = pl.cdiv(M, tm_eff) * tm_eff            # pad rows instead of asserting
    grid = (Mp // tm_eff,)

    ids_flat = ids.reshape(M).astype(jnp.int32)
    ids_p = jnp.pad(ids_flat, (0, Mp - M)).reshape(Mp, 1)   # pad token 0 (valid row)

    itemsize = jnp.dtype(table.dtype).itemsize
    # Explicit VMEM budget: double-buffered ids/out tiles + resident table
    # + one-hot intermediate, with headroom; capped at 32 MiB (safe on v5e/v6e/v7x).
    vmem_need = (2 * tm_eff * 1 * 4
                 + 2 * n_token * D * itemsize
                 + 2 * tm_eff * D * itemsize
                 + tm_eff * n_token * 4)
    vmem_limit = int(min(max(2 * vmem_need + (1 << 20), 4 << 20), 32 << 20))

    cost = pl.CostEstimate(
        flops=2 * Mp * n_token * D,
        transcendentals=0,
        bytes_accessed=Mp * 4 + n_token * D * itemsize + Mp * D * itemsize,
    )

    # TODO(synk): for vocabularies too large to keep resident in VMEM, switch to
    # a per-row BlockSpec gather (scalar-prefetched ids driving the table index_map).
    out = pl.pallas_call(
        functools.partial(_embed_kernel, scale=float(math.sqrt(D))),
        out_shape=jax.ShapeDtypeStruct((Mp, D), table.dtype),
        grid_spec=pltpu.PrefetchScalarGridSpec(
            num_scalar_prefetch=0,
            grid=grid,
            in_specs=[
                pl.BlockSpec((tm_eff, 1), lambda i: (i, 0)),      # ids row tile
                pl.BlockSpec((n_token, D), lambda i: (0, 0)),     # table, resident
            ],
            out_specs=pl.BlockSpec((tm_eff, D), lambda i: (i, 0)),
        ),
        compiler_params=pltpu.CompilerParams(
            dimension_semantics=("parallel",),
            vmem_limit_bytes=vmem_limit,
        ),
        cost_estimate=cost,
    )(ids_p, table)

    return out[:M].reshape(B, S, D)


def _reference(ids, table):
    return table[ids] * math.sqrt(table.shape[1])


if __name__ == "__main__":
    # Small shapes consistent with the module: (batch, seq) int ids -> (batch, seq, dim_model)
    B, S = 2, 8
    n_token, dim_model = 128, 32

    key = jax.random.PRNGKey(0)
    k_ids, k_tab = jax.random.split(key)

    ids = jax.random.randint(k_ids, (B, S), 0, n_token, dtype=jnp.int32)
    table = jax.random.normal(k_tab, (n_token, dim_model), dtype=jnp.float32)

    out = token_embedding_layer(ids, table)
    out = jax.block_until_ready(out)

    ref = _reference(ids, table)
    assert out.shape == (B, S, dim_model)
    assert jnp.allclose(out, ref, atol=1e-5, rtol=1e-5), "mismatch vs reference"

    print("KERNEL_OK")
</pallas_src>

<mosaic_0001>
module attributes {stable_mosaic.version = 11 : i64} {
  func.func @_embed_kernel(%arg0: i32, %arg1: memref<16x1xi32, #tpu.memory_space<vmem>>, %arg2: memref<128x32xf32, #tpu.memory_space<vmem>>, %arg3: memref<16x32xf32, #tpu.memory_space<vmem>>) attributes {dimension_semantics = [#tpu.dimension_semantics<parallel>], iteration_bounds = array<i64: 1>, scalar_prefetch = 0 : i64, scratch_operands = 0 : i64, tpu.core_type = #tpu.core_type<tc>, window_params = [{transform_indices = @transform_0, window_bounds = array<i64: 16, 1>}, {pipeline_mode = #tpu.pipeline_mode<synchronous>, transform_indices = @transform_1, window_bounds = array<i64: 128, 32>}, {transform_indices = @transform_2, window_bounds = array<i64: 16, 32>}]} {
    %c0 = arith.constant 0 : index
    %c0_0 = arith.constant 0 : index
    %0 = vector.load %arg1[%c0, %c0_0] : memref<16x1xi32, #tpu.memory_space<vmem>>, vector<16x1xi32>
    %1 = tpu.iota {dimensions = array<i32: 1>} : vector<16x128xi32>
    %2 = vector.broadcast %0 : vector<16x1xi32> to vector<16x128xi32>
    %3 = arith.cmpi eq, %1, %2 : vector<16x128xi32>
    %4 = arith.extui %3 : vector<16x128xi1> to vector<16x128xi32>
    %5 = arith.sitofp %4 : vector<16x128xi32> to vector<16x128xf32>
    %c0_1 = arith.constant 0 : index
    %c0_2 = arith.constant 0 : index
    %6 = vector.load %arg2[%c0_1, %c0_2] : memref<128x32xf32, #tpu.memory_space<vmem>>, vector<128x32xf32>
    %cst = arith.constant dense<0.000000e+00> : vector<16x32xf32>
    %7 = tpu.matmul %5, %6, %cst {dimension_numbers = #tpu.dot_dimension_numbers<[1], [0], [0], [1], [0, 0, 1, 1], [], []>} : vector<16x128xf32>, vector<128x32xf32>, vector<16x32xf32> -> vector<16x32xf32>
    %cst_3 = arith.constant 5.65685415 : f32
    %8 = vector.broadcast %cst_3 : f32 to vector<16x32xf32>
    %9 = arith.mulf %7, %8 : vector<16x32xf32>
    %c0_4 = arith.constant 0 : index
    %c0_5 = arith.constant 0 : index
    %10 = vector.load %arg3[%c0_4, %c0_5] : memref<16x32xf32, #tpu.memory_space<vmem>>, vector<16x32xf32>
    tpu.vector_store %arg3[%c0_4, %c0_5], %9 {strides = array<i32>} : memref<16x32xf32, #tpu.memory_space<vmem>>, vector<16x32xf32>,
    return
  }
  func.func @transform_0(%arg0: i32) -> (i32, i32) {
    %c0_i32 = arith.constant 0 : i32
    %c0_i32_0 = arith.constant 0 : i32
    return %arg0, %c0_i32 : i32, i32
  }
  func.func @transform_1(%arg0: i32) -> (i32, i32) {
    %c0_i32 = arith.constant 0 : i32
    %c0_i32_0 = arith.constant 0 : i32
    %c0_i32_1 = arith.constant 0 : i32
    return %c0_i32, %c0_i32_0 : i32, i32
  }
  func.func @transform_2(%arg0: i32) -> (i32, i32) {
    %c0_i32 = arith.constant 0 : i32
    %c0_i32_0 = arith.constant 0 : i32
    return %arg0, %c0_i32 : i32, i32
  }
}

</mosaic_0001>

<bundles_post_ra>
// kernel: token_embedding_layer.1
= control target key start
LH: loop header
LB: loop body
LE: loop exit
PB: predicated region body
PF: predicated region fallthrough
CT: control target
= control target key end

     0   :  { %v259_v2 = vmov 0   ;;  %s345_s0 = inlined_call_operand.vmem [shape: s32[16,1], index: 0, kind: input, shape index: {}]   ;;  %s346_s1 = inlined_call_operand.vmem [shape: f32[128,32], index: 1, kind: input, shape index: {}]   ;;  %s347_s2 = inlined_call_operand.hbm [shape: f32[16,32], index: 2, kind: output, shape index: {}]  }
   0x1   :  { %v12_v0 = vld [vmem:[%s345_s0] sm:$0xff]  ;;  %234 = vset.pattern.permute.xlu0 %v259_v2  ;;  %v29_v3 = vld [vmem:[%s346_s1 + $0x8] sm:$0xff]  ;;  %v30_v4 = vld [vmem:[%s346_s1 + $0x10] sm:$0xff] }
   0x2   :  { %v28_v1 = vld [vmem:[%s346_s1] sm:$0xff]  ;;  %v31_v5 = vld [vmem:[%s346_s1 + $0x18] sm:$0xff]  ;;  %17 = vperm.xlu0 %234, %v12_v0   ;;  %v13_v8 = vld [vmem:[%s345_s0 + $0x8] sm:$0xff] }
   0x3   :  { %v197_v6 = vpack.c.bf16 %v29_v3, %v28_v1  ;;  %v201_v7 = vpack.c.bf16 %v31_v5, %v30_v4  ;;  %v32_v9 = vld [vmem:[%s346_s1 + $0x20] sm:$0xff]  ;;  %v33_v10 = vld [vmem:[%s346_s1 + $0x28] sm:$0xff] }
   0x4   :  { %v205_v11 = vpack.c.bf16 %v33_v10, %v32_v9 }
   0x5   :  { %198 = vmatprep.subr.bf16.mxu0 %v197_v6 }
   0x6   :  { %200 = vmatpush3.bf16.msra.mxu0 %v197_v6  ;;  %20 = vperm.xlu0 %234, %v13_v8  }
   0x7   :  { %202 = vmatprep.subr.bf16.mxu0 %v201_v7 }
   0x8   :  { %7 = vsyncpa [#allocation3], 0  ;;  %v34_v12 = vld [vmem:[%s346_s1 + $0x30] sm:$0xff]  ;;  %v35_v13 = vld [vmem:[%s346_s1 + $0x38] sm:$0xff]  ;;  %v14_v27 = vlaneseq  ;;  %v260_v30 = vmov 1.0   ;;  %s261_s16 = smov [#allocation2]  }
   0x9   :  { %v209_v14 = vpack.c.bf16 %v35_v13, %v34_v12  ;;  %v36_v15 = vld [vmem:[%s346_s1 + $0x40] sm:$0xff]  ;;  %v37_v16 = vld [vmem:[%s346_s1 + $0x48] sm:$0xff]  ;;  %v38_v18 = vld [vmem:[%s346_s1 + $0x50] sm:$0xff]  ;;  %s129_s17 = sshll.u32 %s261_s16, 4  ;;  %vm121_vm2 = vcmask 261120   ;;  %s130_s17 = int_to_ptr.vmem [resolvable:$true] %s129_s17 }
   0xa   :  { %204 = vmatpush3.bf16.msra.mxu0 %v201_v7  ;;  %v213_v17 = vpack.c.bf16 %v37_v16, %v36_v15  ;;  %v39_v19 = vld [vmem:[%s346_s1 + $0x58] sm:$0xff]  ;;  %v40_v21 = vld [vmem:[%s346_s1 + $0x60] sm:$0xff]  ;;  %v41_v22 = vld [vmem:[%s346_s1 + $0x68] sm:$0xff]  ;;  %v15_v28 = vand.u32 127, %v14_v27  ;;  %p240_p1 = scmp.lt.s32.totalorder %s130_s17, %s130_s17 }
   0xb   :  { %206 = vmatprep.subr.bf16.mxu0 %v205_v11  ;;  %v217_v20 = vpack.c.bf16 %v39_v19, %v38_v18  ;;  %v221_v23 = vpack.c.bf16 %v41_v22, %v40_v21  ;;  %v42_v24 = vld [vmem:[%s346_s1 + $0x70] sm:$0xff]  ;;  %v43_v25 = vld [vmem:[%s346_s1 + $0x78] sm:$0xff]  ;;  %s235_s1 = scalar_lea.vmem %s130_s17, 256 }
   0xc   :  { %v225_v26 = vpack.c.bf16 %v43_v25, %v42_v24  ;;  %p236_p0 = scmp.ne.s32.totalorder %s130_s17, %s235_s1  ;;  %p241_p2 = scmp.lt.s32.totalorder %s235_s1, %s235_s1 }
   0xe   :  { %208 = vmatpush3.bf16.msra.mxu0 %v205_v11  ;;  %p242_p3 = por %p241_p2, %p240_p1 }
   0xf   :  { %210 = vmatprep.subr.bf16.mxu0 %v209_v14 }
  0x10   :  { %p243_p4 = pnand %p242_p3, %p236_p0 }
  0x12   :  { %212 = vmatpush3.bf16.msra.mxu0 %v209_v14 }
  0x13   :  { %214 = vmatprep.subr.bf16.mxu0 %v213_v17 }
  0x16   :  { %216 = vmatpush3.bf16.msra.mxu0 %v213_v17 }
  0x17   :  { %218 = vmatprep.subr.bf16.mxu0 %v217_v20 }
  0x1a   :  { %220 = vmatpush3.bf16.msra.mxu0 %v217_v20 }
  0x1b   :  { %222 = vmatprep.subr.bf16.mxu0 %v221_v23 }
  0x1e   :  { %224 = vmatpush3.bf16.msra.mxu0 %v221_v23 }
  0x1f   :  { %226 = vmatprep.subr.bf16.mxu0 %v225_v26 }
  0x22   :  { %228 = vmatpush3.bf16.msra.mxu0 %v225_v26 }
  0x81   :  { %v18_v29 = vpop.permute.xlu0 %17 }
  0x82   :  { %vm22_vm0 = vcmp.eq.s32.totalorder %v15_v28, %v18_v29 }
  0x83   :  { %194 = vmatprep.mubr.msk.f32.mxu0 %vm22_vm0, %v260_v30 }
  0x85   :  { %v21_v31 = vpop.permute.xlu0 %20 }
  0x86   :  { %vm23_vm1 = vcmp.eq.s32.totalorder %v15_v28, %v21_v31 }
  0x87   :  { %195 = vmatmul.mubr.msk.f32.vlgmr.msra.gmra.mrb[0].mxu0 %vm23_vm1, %v260_v30 }
 0x15a   :  { %v196_v32 = vpop.f32.mrb[0].mxu0 }
 0x15b   :  { %v120_v33 = vmul.f32 5.656854, %v196_v32  ;;  %v110_v34 = vpop.f32.mrb[1].mxu0 }
 0x15c   :  { %v119_v35 = vmul.f32 5.656854, %v110_v34 }
 0x15d   :  { %123 = vst.msk [vmem:[#allocation2 + $0x8] sm:$0xff] %vm121_vm2, %v120_v33 }
 0x15e   :  { %122 = vst.msk [vmem:[#allocation2] sm:$0xff] %vm121_vm2, %v119_v35 }
 0x15f   :  { %246 = shalt.err (!%p243_p4)
}
 0x160   :  { %s247_s20 = scalar_lea.hbm %s347_s2, 256 }
 0x161   :  { %p248_p5 = scmp.ne.s32.totalorder %s347_s2, %s247_s20  ;;  %p251_p6 = scmp.lt.u32.totalorder %s247_s20, %s347_s2 }
 0x163   :  { %p253_p7 = pnand %p251_p6, %p248_p5 }
 0x165   :  { %256 = shalt.err (!%p253_p7)
}
 0x166   :  { %s262_s25 = smov 128   ;;  %s263_s26 = smov 8  }
 0x167   :  { %135 = dma.vmem_to_hbm [thread:$0]  %s130_s17, 256, %s347_s2, [#allocation3], %s262_s25, %s262_s25, %s263_s26  }
 0x168   :  { %257 = dma.done.wait [#allocation3], 256  }
 0x169   :  { %258 = vsyncadd [#allocation3], 4294967040 }
 0x16a   :  { %139 = vsyncpa [#allocation3], 1 }

</bundles_post_ra>
